<compile_context>
chip_gen: v5e
topology: v5e:2x2
jax: 0.10.0
libtpu: 0.0.40
codegen_flags: <defaults>
</compile_context>

<pallas_src>
import functools

import jax
import jax.numpy as jnp
from jax.experimental import pallas as pl
from jax.experimental.pallas import tpu as pltpu

EPS = 1e-5
LANE = 128


def _round_up(x, m):
    return (x + m - 1) // m * m


def _fused_sepconv_kernel(xsd_ref, dw1_ref, pw1_ref, b1_ref,
                          dw2_ref, pw2_ref, b2_ref, out_ref, y1_ref, *,
                          valid_w):
    """Both SepConv halves for one batch element, fully resident in VMEM.

    xsd_ref : (4, Hq, Wq, C_in)  2x2 space-to-depth phases (leading dim), real channels
    dw1_ref : (9, 1, C_in)       depthwise 3x3 weights, stage 1 (row-major taps), f32
    pw1_ref : (C_in, Cp)         pointwise weights, BN scale folded in, bf16
    b1_ref  : (1, Cp)            folded BN bias, stage 1, f32
    dw2_ref : (9, 1, Cp)         depthwise 3x3 weights, stage 2, f32 (zero-padded lanes)
    pw2_ref : (Cp, Cop)          pointwise weights, BN scale folded in, bf16
    b2_ref  : (1, Cop)           folded BN bias, stage 2, f32
    out_ref : (H1, W1p, Cop)
    y1_ref  : VMEM scratch (H1+2, W1p+16, Cp) — stage-1 output, 8-wide aligned halo
    """
    h1, w1p, cop = out_ref.shape
    cp = pw2_ref.shape[0]
    w1h = y1_ref.shape[1]            # w1p + 16 (8-wide halo on both sides)

    # ---- zero ONLY the halo strips the stage-2 taps read (every step => safe
    # under megacore sharding).  All four stores are sublane/lane aligned.
    zero_row = jnp.zeros((1, w1h, cp), jnp.float32)
    zero_col = jnp.zeros((h1, 8, cp), jnp.float32)
    y1_ref[pl.ds(0, 1), :, :] = zero_row
    y1_ref[pl.ds(h1 + 1, 1), :, :] = zero_row
    y1_ref[pl.ds(1, h1), pl.ds(0, 8), :] = zero_col
    y1_ref[pl.ds(1, h1), pl.ds(8 + w1p, 8), :] = zero_col

    # ---------------- stage 1: depthwise 3x3, stride 2 (VPU) ----------------
    # Phases are a leading dim -> every tap is a unit-stride slice, no lane math.
    acc1 = None
    for kh in range(3):
        for kw in range(3):
            t = (kh % 2) * 2 + (kw % 2)       # 2x2 phase index
            oh, ow = kh // 2, kw // 2         # offset inside the phase grid
            tap = xsd_ref[t, pl.ds(oh, h1), pl.ds(ow, w1p), :].astype(jnp.float32)
            term = tap * dw1_ref[kh * 3 + kw]
            acc1 = term if acc1 is None else acc1 + term
    c_in = acc1.shape[-1]

    # pointwise 1x1 conv (BN scale folded into the columns): bf16 MXU, f32 acc.
    z1 = jnp.dot(acc1.reshape(h1 * w1p, c_in).astype(jnp.bfloat16),
                 pw1_ref[...], preferred_element_type=jnp.float32)
    z1 = jnp.maximum(z1 + b1_ref[...], 0.0).reshape(h1, w1p, cp)
    if valid_w < w1p:
        # Columns >= valid_w are spatial padding; force them to zero so they act
        # as the correct stage-2 right halo for the last valid column.
        col = jax.lax.broadcasted_iota(jnp.int32, (h1, w1p, cp), 1)
        z1 = jnp.where(col < valid_w, z1, 0.0)

    # stage-1 activation stays in VMEM; aligned, lane-dense interior store
    # (W offset 8 = sublane-tile boundary, Cp multiple of 128).
    y1_ref[pl.ds(1, h1), pl.ds(8, w1p), :] = z1

    # ---------------- stage 2: depthwise 3x3, stride 1 (VPU) ----------------
    acc2 = None
    for kh in range(3):
        for kw in range(3):
            tap = y1_ref[pl.ds(kh, h1), pl.ds(7 + kw, w1p), :]
            term = tap * dw2_ref[kh * 3 + kw]
            acc2 = term if acc2 is None else acc2 + term

    z2 = jnp.dot(acc2.reshape(h1 * w1p, cp).astype(jnp.bfloat16),
                 pw2_ref[...], preferred_element_type=jnp.float32)
    z2 = jnp.maximum(z2 + b2_ref[...], 0.0)
    out_ref[...] = z2.reshape(h1, w1p, cop).astype(out_ref.dtype)


def sepconv_forward(x_nchw, params, k=3):
    """SepConv.forward — NCHW in, NCHW out (matches the PyTorch module)."""
    assert k == 3, "fused kernel is specialized to the module default k=3"
    n, c_in, h, w = x_nchw.shape
    c_out = params["pw2"].shape[1]
    cp = _round_up(c_in, LANE)       # stage-1 output / stage-2 input lanes
    cop = _round_up(c_out, LANE)     # output lanes (lane-dense stores)

    # output spatial size of the stride-2 stage (stage 2 preserves it)
    h1 = (h + 2 - 3) // 2 + 1
    w1 = (w + 2 - 3) // 2 + 1
    w1p = _round_up(w1, 8)           # keep the matmul M dim tile-aligned
    hq, wq = h1 + 1, w1p + 1         # space-to-depth grid incl. 3x3/s2 halo
    hp, wp = 2 * hq, 2 * wq

    # NCHW -> NHWC, spatial halo pad only.  NO input channel padding in HBM:
    # only real bytes are DMA'd; lane padding goes on the tiny weights instead.
    x = jnp.transpose(x_nchw, (0, 2, 3, 1))
    x = jnp.pad(x, ((0, 0), (1, hp - h - 1), (1, wp - w - 1), (0, 0)))
    # 2x2 space-to-depth with the phase on a leading dim (no lane packing),
    # folded into the batch dim so the pallas_call sees a rank-4 array.
    x = x.reshape(n, hq, 2, wq, 2, c_in)
    xsd = jnp.transpose(x, (0, 2, 4, 1, 3, 5)).reshape(n * 4, hq, wq, c_in)

    # fold eval-mode BatchNorm: scale -> pointwise weight columns, keep bias.
    s1 = params["bn1_gamma"] / jnp.sqrt(params["bn1_var"] + EPS)
    b1 = params["bn1_beta"] - params["bn1_mean"] * s1
    s2 = params["bn2_gamma"] / jnp.sqrt(params["bn2_var"] + EPS)
    b2 = params["bn2_beta"] - params["bn2_mean"] * s2

    dw1 = params["dw1"].reshape(9, 1, c_in).astype(jnp.float32)
    dw2 = jnp.pad(params["dw2"].reshape(9, 1, c_in).astype(jnp.float32),
                  ((0, 0), (0, 0), (0, cp - c_in)))
    # bf16 MXU operands (accumulation stays f32 inside the kernel)
    pw1 = jnp.pad(params["pw1"] * s1[None, :],
                  ((0, 0), (0, cp - c_in))).astype(jnp.bfloat16)            # (C_in, Cp)
    pw2 = jnp.pad(params["pw2"] * s2[None, :],
                  ((0, cp - c_in), (0, cop - c_out))).astype(jnp.bfloat16)  # (Cp, Cop)
    b1p = jnp.pad(b1.reshape(1, c_in), ((0, 0), (0, cp - c_in))).astype(jnp.float32)
    b2p = jnp.pad(b2.reshape(1, c_out), ((0, 0), (0, cop - c_out))).astype(jnp.float32)

    kernel = functools.partial(_fused_sepconv_kernel, valid_w=w1)
    out = pl.pallas_call(
        kernel,
        out_shape=jax.ShapeDtypeStruct((n, h1, w1p, cop), x_nchw.dtype),
        grid_spec=pltpu.PrefetchScalarGridSpec(
            num_scalar_prefetch=0,
            grid=(n,),  # one batch element per grid step
            in_specs=[
                pl.BlockSpec((4, hq, wq, c_in), lambda i: (i, 0, 0, 0)),
                pl.BlockSpec((9, 1, c_in), lambda i: (0, 0, 0)),
                pl.BlockSpec((c_in, cp), lambda i: (0, 0)),
                pl.BlockSpec((1, cp), lambda i: (0, 0)),
                pl.BlockSpec((9, 1, cp), lambda i: (0, 0, 0)),
                pl.BlockSpec((cp, cop), lambda i: (0, 0)),
                pl.BlockSpec((1, cop), lambda i: (0, 0)),
            ],
            out_specs=pl.BlockSpec((None, h1, w1p, cop), lambda i: (i, 0, 0, 0)),
            scratch_shapes=[pltpu.VMEM((h1 + 2, w1p + 16, cp), jnp.float32)],
        ),
        compiler_params=pltpu.CompilerParams(
            dimension_semantics=("parallel",),
            vmem_limit_bytes=32 * 1024 * 1024,
        ),
    )(xsd, dw1, pw1, b1p, dw2, pw2, b2p)

    out = out[:, :, :w1, :c_out]               # strip spatial/lane padding
    return jnp.transpose(out, (0, 3, 1, 2))    # NHWC -> NCHW


def init_sepconv_params(key, channel_in, channel_out, k=3):
    ks = jax.random.split(key, 12)
    p = {
        # depthwise weights stored as (k, k, C)  (PyTorch: (C, 1, k, k))
        "dw1": 0.2 * jax.random.normal(ks[0], (k, k, channel_in), jnp.float32),
        # pointwise weights stored as (Cin, Cout)  (PyTorch: (Cout, Cin, 1, 1))
        "pw1": 0.2 * jax.random.normal(ks[1], (channel_in, channel_in), jnp.float32),
        "bn1_gamma": 1.0 + 0.1 * jax.random.normal(ks[2], (channel_in,), jnp.float32),
        "bn1_beta": 0.05 * jax.random.normal(ks[3], (channel_in,), jnp.float32),
        "bn1_mean": 0.1 * jax.random.normal(ks[4], (channel_in,), jnp.float32),
        "bn1_var": 1.0 + 0.1 * jnp.abs(jax.random.normal(ks[5], (channel_in,), jnp.float32)),
        "dw2": 0.2 * jax.random.normal(ks[6], (k, k, channel_in), jnp.float32),
        "pw2": 0.2 * jax.random.normal(ks[7], (channel_in, channel_out), jnp.float32),
        "bn2_gamma": 1.0 + 0.1 * jax.random.normal(ks[8], (channel_out,), jnp.float32),
        "bn2_beta": 0.05 * jax.random.normal(ks[9], (channel_out,), jnp.float32),
        "bn2_mean": 0.1 * jax.random.normal(ks[10], (channel_out,), jnp.float32),
        "bn2_var": 1.0 + 0.1 * jnp.abs(jax.random.normal(ks[11], (channel_out,), jnp.float32)),
    }
    return p


# ---------------- pure-JAX reference (for correctness check) -----------------
def _ref_sepconv(x_nchw, p, k=3):
    hp = jax.lax.Precision.HIGHEST

    def dw_conv(x, w_kkc, stride):
        cin = x.shape[1]
        w = jnp.transpose(w_kkc, (2, 0, 1))[:, None, :, :]  # (Cin, 1, k, k)
        return jax.lax.conv_general_dilated(
            x, w, (stride, stride), [(1, 1), (1, 1)],
            dimension_numbers=("NCHW", "OIHW", "NCHW"),
            feature_group_count=cin, precision=hp)

    def pw_conv(x, w_cico):
        w = jnp.transpose(w_cico)[:, :, None, None]  # (Cout, Cin, 1, 1)
        return jax.lax.conv_general_dilated(
            x, w, (1, 1), [(0, 0), (0, 0)],
            dimension_numbers=("NCHW", "OIHW", "NCHW"), precision=hp)

    def bn_relu(x, gamma, beta, mean, var):
        s = gamma / jnp.sqrt(var + EPS)
        b = beta - mean * s
        y = x * s[None, :, None, None] + b[None, :, None, None]
        return jnp.maximum(y, 0.0)

    y = dw_conv(x_nchw, p["dw1"], 2)
    y = pw_conv(y, p["pw1"])
    y = bn_relu(y, p["bn1_gamma"], p["bn1_beta"], p["bn1_mean"], p["bn1_var"])
    y = dw_conv(y, p["dw2"], 1)
    y = pw_conv(y, p["pw2"])
    y = bn_relu(y, p["bn2_gamma"], p["bn2_beta"], p["bn2_mean"], p["bn2_var"])
    return y


if __name__ == "__main__":
    key = jax.random.PRNGKey(0)
    k_x, k_p = jax.random.split(key)

    N, C_IN, C_OUT, H, W = 2, 4, 8, 16, 16
    x = jax.random.normal(k_x, (N, C_IN, H, W), jnp.float32)
    params = init_sepconv_params(k_p, C_IN, C_OUT)

    out = jax.jit(sepconv_forward)(x, params)
    out = jax.block_until_ready(out)

    ref = _ref_sepconv(x, params)
    assert out.shape == (N, C_OUT, H // 2, W // 2), out.shape
    # bf16 MXU operands inside the kernel -> compare with a bf16-appropriate tol
    max_err = float(jnp.max(jnp.abs(out - ref)))
    assert jnp.allclose(out, ref, atol=5e-2, rtol=5e-2), max_err

    print("KERNEL_OK")
</pallas_src>

<mosaic_0001>
module attributes {stable_mosaic.version = 11 : i64} {
  func.func @_fused_sepconv_kernel(%arg0: i32, %arg1: memref<4x9x9x4xf32, #tpu.memory_space<vmem>>, %arg2: memref<9x1x4xf32, #tpu.memory_space<vmem>>, %arg3: memref<4x128xbf16, #tpu.memory_space<vmem>>, %arg4: memref<1x128xf32, #tpu.memory_space<vmem>>, %arg5: memref<9x1x128xf32, #tpu.memory_space<vmem>>, %arg6: memref<128x128xbf16, #tpu.memory_space<vmem>>, %arg7: memref<1x128xf32, #tpu.memory_space<vmem>>, %arg8: memref<1x8x8x128xf32, #tpu.memory_space<vmem>>, %arg9: memref<10x24x128xf32, #tpu.memory_space<vmem>>) attributes {dimension_semantics = [#tpu.dimension_semantics<parallel>], iteration_bounds = array<i64: 2>, scalar_prefetch = 0 : i64, scratch_operands = 1 : i64, tpu.core_type = #tpu.core_type<tc>, window_params = [{transform_indices = @transform_0, window_bounds = array<i64: 4, 9, 9, 4>}, {pipeline_mode = #tpu.pipeline_mode<synchronous>, transform_indices = @transform_1, window_bounds = array<i64: 9, 1, 4>}, {pipeline_mode = #tpu.pipeline_mode<synchronous>, transform_indices = @transform_2, window_bounds = array<i64: 4, 128>}, {pipeline_mode = #tpu.pipeline_mode<synchronous>, transform_indices = @transform_3, window_bounds = array<i64: 1, 128>}, {pipeline_mode = #tpu.pipeline_mode<synchronous>, transform_indices = @transform_4, window_bounds = array<i64: 9, 1, 128>}, {pipeline_mode = #tpu.pipeline_mode<synchronous>, transform_indices = @transform_5, window_bounds = array<i64: 128, 128>}, {pipeline_mode = #tpu.pipeline_mode<synchronous>, transform_indices = @transform_6, window_bounds = array<i64: 1, 128>}, {transform_indices = @transform_7, window_bounds = array<i64: 1, 8, 8, 128>}]} {
    %cst = arith.constant 0.000000e+00 : f32
    %0 = vector.broadcast %cst : f32 to vector<1x24x128xf32>
    %cst_0 = arith.constant 0.000000e+00 : f32
    %1 = vector.broadcast %cst_0 : f32 to vector<8x8x128xf32>
    %c0 = arith.constant 0 : index
    %c0_1 = arith.constant 0 : index
    %c0_2 = arith.constant 0 : index
    %2 = vector.load %arg9[%c0, %c0_1, %c0_2] : memref<10x24x128xf32, #tpu.memory_space<vmem>>, vector<1x24x128xf32>
    tpu.vector_store %arg9[%c0, %c0_1, %c0_2], %0 {strides = array<i32>} : memref<10x24x128xf32, #tpu.memory_space<vmem>>, vector<1x24x128xf32>,
    %c9 = arith.constant 9 : index
    %c0_3 = arith.constant 0 : index
    %c0_4 = arith.constant 0 : index
    %3 = vector.load %arg9[%c9, %c0_3, %c0_4] : memref<10x24x128xf32, #tpu.memory_space<vmem>>, vector<1x24x128xf32>
    tpu.vector_store %arg9[%c9, %c0_3, %c0_4], %0 {strides = array<i32>} : memref<10x24x128xf32, #tpu.memory_space<vmem>>, vector<1x24x128xf32>,
    %c1 = arith.constant 1 : index
    %c0_5 = arith.constant 0 : index
    %c0_6 = arith.constant 0 : index
    %4 = vector.load %arg9[%c1, %c0_5, %c0_6] : memref<10x24x128xf32, #tpu.memory_space<vmem>>, vector<8x8x128xf32>
    tpu.vector_store %arg9[%c1, %c0_5, %c0_6], %1 {strides = array<i32>} : memref<10x24x128xf32, #tpu.memory_space<vmem>>, vector<8x8x128xf32>,
    %c1_7 = arith.constant 1 : index
    %c16 = arith.constant 16 : index
    %c0_8 = arith.constant 0 : index
    %5 = vector.load %arg9[%c1_7, %c16, %c0_8] : memref<10x24x128xf32, #tpu.memory_space<vmem>>, vector<8x8x128xf32>
    tpu.vector_store %arg9[%c1_7, %c16, %c0_8], %1 {strides = array<i32>} : memref<10x24x128xf32, #tpu.memory_space<vmem>>, vector<8x8x128xf32>,
    %c0_9 = arith.constant 0 : index
    %c0_10 = arith.constant 0 : index
    %c0_11 = arith.constant 0 : index
    %c0_12 = arith.constant 0 : index
    %6 = vector.load %arg1[%c0_9, %c0_10, %c0_11, %c0_12] : memref<4x9x9x4xf32, #tpu.memory_space<vmem>>, vector<1x8x8x4xf32>
    %7 = vector.shape_cast %6 : vector<1x8x8x4xf32> to vector<8x8x4xf32>
    %c0_13 = arith.constant 0 : index
    %c0_14 = arith.constant 0 : index
    %c0_15 = arith.constant 0 : index
    %8 = vector.load %arg2[%c0_13, %c0_14, %c0_15] : memref<9x1x4xf32, #tpu.memory_space<vmem>>, vector<1x1x4xf32>
    %9 = vector.shape_cast %8 : vector<1x1x4xf32> to vector<1x4xf32>
    %10 = vector.shape_cast %9 : vector<1x4xf32> to vector<1x1x4xf32>
    %11 = vector.broadcast %10 : vector<1x1x4xf32> to vector<8x8x4xf32>
    %12 = arith.mulf %7, %11 : vector<8x8x4xf32>
    %c1_16 = arith.constant 1 : index
    %c0_17 = arith.constant 0 : index
    %c0_18 = arith.constant 0 : index
    %c0_19 = arith.constant 0 : index
    %13 = vector.load %arg1[%c1_16, %c0_17, %c0_18, %c0_19] : memref<4x9x9x4xf32, #tpu.memory_space<vmem>>, vector<1x8x8x4xf32>
    %14 = vector.shape_cast %13 : vector<1x8x8x4xf32> to vector<8x8x4xf32>
    %c1_20 = arith.constant 1 : index
    %c0_21 = arith.constant 0 : index
    %c0_22 = arith.constant 0 : index
    %15 = vector.load %arg2[%c1_20, %c0_21, %c0_22] : memref<9x1x4xf32, #tpu.memory_space<vmem>>, vector<1x1x4xf32>
    %16 = vector.shape_cast %15 : vector<1x1x4xf32> to vector<1x4xf32>
    %17 = vector.shape_cast %16 : vector<1x4xf32> to vector<1x1x4xf32>
    %18 = vector.broadcast %17 : vector<1x1x4xf32> to vector<8x8x4xf32>
    %19 = arith.mulf %14, %18 : vector<8x8x4xf32>
    %20 = arith.addf %12, %19 : vector<8x8x4xf32>
    %c0_23 = arith.constant 0 : index
    %c0_24 = arith.constant 0 : index
    %c1_25 = arith.constant 1 : index
    %c0_26 = arith.constant 0 : index
    %21 = vector.load %arg1[%c0_23, %c0_24, %c1_25, %c0_26] : memref<4x9x9x4xf32, #tpu.memory_space<vmem>>, vector<1x8x8x4xf32>
    %22 = vector.shape_cast %21 : vector<1x8x8x4xf32> to vector<8x8x4xf32>
    %c2 = arith.constant 2 : index
    %c0_27 = arith.constant 0 : index
    %c0_28 = arith.constant 0 : index
    %23 = vector.load %arg2[%c2, %c0_27, %c0_28] : memref<9x1x4xf32, #tpu.memory_space<vmem>>, vector<1x1x4xf32>
    %24 = vector.shape_cast %23 : vector<1x1x4xf32> to vector<1x4xf32>
    %25 = vector.shape_cast %24 : vector<1x4xf32> to vector<1x1x4xf32>
    %26 = vector.broadcast %25 : vector<1x1x4xf32> to vector<8x8x4xf32>
    %27 = arith.mulf %22, %26 : vector<8x8x4xf32>
    %28 = arith.addf %20, %27 : vector<8x8x4xf32>
    %c2_29 = arith.constant 2 : index
    %c0_30 = arith.constant 0 : index
    %c0_31 = arith.constant 0 : index
    %c0_32 = arith.constant 0 : index
    %29 = vector.load %arg1[%c2_29, %c0_30, %c0_31, %c0_32] : memref<4x9x9x4xf32, #tpu.memory_space<vmem>>, vector<1x8x8x4xf32>
    %30 = vector.shape_cast %29 : vector<1x8x8x4xf32> to vector<8x8x4xf32>
    %c3 = arith.constant 3 : index
    %c0_33 = arith.constant 0 : index
    %c0_34 = arith.constant 0 : index
    %31 = vector.load %arg2[%c3, %c0_33, %c0_34] : memref<9x1x4xf32, #tpu.memory_space<vmem>>, vector<1x1x4xf32>
    %32 = vector.shape_cast %31 : vector<1x1x4xf32> to vector<1x4xf32>
    %33 = vector.shape_cast %32 : vector<1x4xf32> to vector<1x1x4xf32>
    %34 = vector.broadcast %33 : vector<1x1x4xf32> to vector<8x8x4xf32>
    %35 = arith.mulf %30, %34 : vector<8x8x4xf32>
    %36 = arith.addf %28, %35 : vector<8x8x4xf32>
    %c3_35 = arith.constant 3 : index
    %c0_36 = arith.constant 0 : index
    %c0_37 = arith.constant 0 : index
    %c0_38 = arith.constant 0 : index
    %37 = vector.load %arg1[%c3_35, %c0_36, %c0_37, %c0_38] : memref<4x9x9x4xf32, #tpu.memory_space<vmem>>, vector<1x8x8x4xf32>
    %38 = vector.shape_cast %37 : vector<1x8x8x4xf32> to vector<8x8x4xf32>
    %c4 = arith.constant 4 : index
    %c0_39 = arith.constant 0 : index
    %c0_40 = arith.constant 0 : index
    %39 = vector.load %arg2[%c4, %c0_39, %c0_40] : memref<9x1x4xf32, #tpu.memory_space<vmem>>, vector<1x1x4xf32>
    %40 = vector.shape_cast %39 : vector<1x1x4xf32> to vector<1x4xf32>
    %41 = vector.shape_cast %40 : vector<1x4xf32> to vector<1x1x4xf32>
    %42 = vector.broadcast %41 : vector<1x1x4xf32> to vector<8x8x4xf32>
    %43 = arith.mulf %38, %42 : vector<8x8x4xf32>
    %44 = arith.addf %36, %43 : vector<8x8x4xf32>
    %c2_41 = arith.constant 2 : index
    %c0_42 = arith.constant 0 : index
    %c1_43 = arith.constant 1 : index
    %c0_44 = arith.constant 0 : index
    %45 = vector.load %arg1[%c2_41, %c0_42, %c1_43, %c0_44] : memref<4x9x9x4xf32, #tpu.memory_space<vmem>>, vector<1x8x8x4xf32>
    %46 = vector.shape_cast %45 : vector<1x8x8x4xf32> to vector<8x8x4xf32>
    %c5 = arith.constant 5 : index
    %c0_45 = arith.constant 0 : index
    %c0_46 = arith.constant 0 : index
    %47 = vector.load %arg2[%c5, %c0_45, %c0_46] : memref<9x1x4xf32, #tpu.memory_space<vmem>>, vector<1x1x4xf32>
    %48 = vector.shape_cast %47 : vector<1x1x4xf32> to vector<1x4xf32>
    %49 = vector.shape_cast %48 : vector<1x4xf32> to vector<1x1x4xf32>
    %50 = vector.broadcast %49 : vector<1x1x4xf32> to vector<8x8x4xf32>
    %51 = arith.mulf %46, %50 : vector<8x8x4xf32>
    %52 = arith.addf %44, %51 : vector<8x8x4xf32>
    %c0_47 = arith.constant 0 : index
    %c1_48 = arith.constant 1 : index
    %c0_49 = arith.constant 0 : index
    %c0_50 = arith.constant 0 : index
    %53 = vector.load %arg1[%c0_47, %c1_48, %c0_49, %c0_50] : memref<4x9x9x4xf32, #tpu.memory_space<vmem>>, vector<1x8x8x4xf32>
    %54 = vector.shape_cast %53 : vector<1x8x8x4xf32> to vector<8x8x4xf32>
    %c6 = arith.constant 6 : index
    %c0_51 = arith.constant 0 : index
    %c0_52 = arith.constant 0 : index
    %55 = vector.load %arg2[%c6, %c0_51, %c0_52] : memref<9x1x4xf32, #tpu.memory_space<vmem>>, vector<1x1x4xf32>
    %56 = vector.shape_cast %55 : vector<1x1x4xf32> to vector<1x4xf32>
    %57 = vector.shape_cast %56 : vector<1x4xf32> to vector<1x1x4xf32>
    %58 = vector.broadcast %57 : vector<1x1x4xf32> to vector<8x8x4xf32>
    %59 = arith.mulf %54, %58 : vector<8x8x4xf32>
    %60 = arith.addf %52, %59 : vector<8x8x4xf32>
    %c1_53 = arith.constant 1 : index
    %c1_54 = arith.constant 1 : index
    %c0_55 = arith.constant 0 : index
    %c0_56 = arith.constant 0 : index
    %61 = vector.load %arg1[%c1_53, %c1_54, %c0_55, %c0_56] : memref<4x9x9x4xf32, #tpu.memory_space<vmem>>, vector<1x8x8x4xf32>
    %62 = vector.shape_cast %61 : vector<1x8x8x4xf32> to vector<8x8x4xf32>
    %c7 = arith.constant 7 : index
    %c0_57 = arith.constant 0 : index
    %c0_58 = arith.constant 0 : index
    %63 = vector.load %arg2[%c7, %c0_57, %c0_58] : memref<9x1x4xf32, #tpu.memory_space<vmem>>, vector<1x1x4xf32>
    %64 = vector.shape_cast %63 : vector<1x1x4xf32> to vector<1x4xf32>
    %65 = vector.shape_cast %64 : vector<1x4xf32> to vector<1x1x4xf32>
    %66 = vector.broadcast %65 : vector<1x1x4xf32> to vector<8x8x4xf32>
    %67 = arith.mulf %62, %66 : vector<8x8x4xf32>
    %68 = arith.addf %60, %67 : vector<8x8x4xf32>
    %c0_59 = arith.constant 0 : index
    %c1_60 = arith.constant 1 : index
    %c1_61 = arith.constant 1 : index
    %c0_62 = arith.constant 0 : index
    %69 = vector.load %arg1[%c0_59, %c1_60, %c1_61, %c0_62] : memref<4x9x9x4xf32, #tpu.memory_space<vmem>>, vector<1x8x8x4xf32>
    %70 = vector.shape_cast %69 : vector<1x8x8x4xf32> to vector<8x8x4xf32>
    %c8 = arith.constant 8 : index
    %c0_63 = arith.constant 0 : index
    %c0_64 = arith.constant 0 : index
    %71 = vector.load %arg2[%c8, %c0_63, %c0_64] : memref<9x1x4xf32, #tpu.memory_space<vmem>>, vector<1x1x4xf32>
    %72 = vector.shape_cast %71 : vector<1x1x4xf32> to vector<1x4xf32>
    %73 = vector.shape_cast %72 : vector<1x4xf32> to vector<1x1x4xf32>
    %74 = vector.broadcast %73 : vector<1x1x4xf32> to vector<8x8x4xf32>
    %75 = arith.mulf %70, %74 : vector<8x8x4xf32>
    %76 = arith.addf %68, %75 : vector<8x8x4xf32>
    %77 = vector.shape_cast %76 : vector<8x8x4xf32> to vector<64x4xf32>
    %78 = arith.truncf %77 : vector<64x4xf32> to vector<64x4xbf16>
    %c0_65 = arith.constant 0 : index
    %c0_66 = arith.constant 0 : index
    %79 = vector.load %arg3[%c0_65, %c0_66] : memref<4x128xbf16, #tpu.memory_space<vmem>>, vector<4x128xbf16>
    %cst_67 = arith.constant dense<0.000000e+00> : vector<64x128xf32>
    %80 = tpu.matmul %78, %79, %cst_67 {dimension_numbers = #tpu.dot_dimension_numbers<[1], [0], [0], [1], [0, 0, 1, 1], [], []>} : vector<64x4xbf16>, vector<4x128xbf16>, vector<64x128xf32> -> vector<64x128xf32>
    %c0_68 = arith.constant 0 : index
    %c0_69 = arith.constant 0 : index
    %81 = vector.load %arg4[%c0_68, %c0_69] : memref<1x128xf32, #tpu.memory_space<vmem>>, vector<1x128xf32>
    %82 = vector.broadcast %81 : vector<1x128xf32> to vector<64x128xf32>
    %83 = arith.addf %80, %82 : vector<64x128xf32>
    %cst_70 = arith.constant 0.000000e+00 : f32
    %84 = vector.broadcast %cst_70 : f32 to vector<64x128xf32>
    %85 = arith.maximumf %83, %84 : vector<64x128xf32>
    %86 = vector.shape_cast %85 : vector<64x128xf32> to vector<8x8x128xf32>
    %c1_71 = arith.constant 1 : index
    %c8_72 = arith.constant 8 : index
    %c0_73 = arith.constant 0 : index
    %87 = vector.load %arg9[%c1_71, %c8_72, %c0_73] : memref<10x24x128xf32, #tpu.memory_space<vmem>>, vector<8x8x128xf32>
    tpu.vector_store %arg9[%c1_71, %c8_72, %c0_73], %86 {strides = array<i32>} : memref<10x24x128xf32, #tpu.memory_space<vmem>>, vector<8x8x128xf32>,
    %c0_74 = arith.constant 0 : index
    %c7_75 = arith.constant 7 : index
    %c0_76 = arith.constant 0 : index
    %88 = vector.load %arg9[%c0_74, %c7_75, %c0_76] : memref<10x24x128xf32, #tpu.memory_space<vmem>>, vector<8x8x128xf32>
    %c0_77 = arith.constant 0 : index
    %c0_78 = arith.constant 0 : index
    %c0_79 = arith.constant 0 : index
    %89 = vector.load %arg5[%c0_77, %c0_78, %c0_79] : memref<9x1x128xf32, #tpu.memory_space<vmem>>, vector<1x1x128xf32>
    %90 = vector.shape_cast %89 : vector<1x1x128xf32> to vector<1x128xf32>
    %91 = vector.shape_cast %90 : vector<1x128xf32> to vector<1x1x128xf32>
    %92 = vector.broadcast %91 : vector<1x1x128xf32> to vector<8x8x128xf32>
    %93 = arith.mulf %88, %92 : vector<8x8x128xf32>
    %c0_80 = arith.constant 0 : index
    %c8_81 = arith.constant 8 : index
    %c0_82 = arith.constant 0 : index
    %94 = vector.load %arg9[%c0_80, %c8_81, %c0_82] : memref<10x24x128xf32, #tpu.memory_space<vmem>>, vector<8x8x128xf32>
    %c1_83 = arith.constant 1 : index
    %c0_84 = arith.constant 0 : index
    %c0_85 = arith.constant 0 : index
    %95 = vector.load %arg5[%c1_83, %c0_84, %c0_85] : memref<9x1x128xf32, #tpu.memory_space<vmem>>, vector<1x1x128xf32>
    %96 = vector.shape_cast %95 : vector<1x1x128xf32> to vector<1x128xf32>
    %97 = vector.shape_cast %96 : vector<1x128xf32> to vector<1x1x128xf32>
    %98 = vector.broadcast %97 : vector<1x1x128xf32> to vector<8x8x128xf32>
    %99 = arith.mulf %94, %98 : vector<8x8x128xf32>
    %100 = arith.addf %93, %99 : vector<8x8x128xf32>
    %c0_86 = arith.constant 0 : index
    %c9_87 = arith.constant 9 : index
    %c0_88 = arith.constant 0 : index
    %101 = vector.load %arg9[%c0_86, %c9_87, %c0_88] : memref<10x24x128xf32, #tpu.memory_space<vmem>>, vector<8x8x128xf32>
    %c2_89 = arith.constant 2 : index
    %c0_90 = arith.constant 0 : index
    %c0_91 = arith.constant 0 : index
    %102 = vector.load %arg5[%c2_89, %c0_90, %c0_91] : memref<9x1x128xf32, #tpu.memory_space<vmem>>, vector<1x1x128xf32>
    %103 = vector.shape_cast %102 : vector<1x1x128xf32> to vector<1x128xf32>
    %104 = vector.shape_cast %103 : vector<1x128xf32> to vector<1x1x128xf32>
    %105 = vector.broadcast %104 : vector<1x1x128xf32> to vector<8x8x128xf32>
    %106 = arith.mulf %101, %105 : vector<8x8x128xf32>
    %107 = arith.addf %100, %106 : vector<8x8x128xf32>
    %c1_92 = arith.constant 1 : index
    %c7_93 = arith.constant 7 : index
    %c0_94 = arith.constant 0 : index
    %108 = vector.load %arg9[%c1_92, %c7_93, %c0_94] : memref<10x24x128xf32, #tpu.memory_space<vmem>>, vector<8x8x128xf32>
    %c3_95 = arith.constant 3 : index
    %c0_96 = arith.constant 0 : index
    %c0_97 = arith.constant 0 : index
    %109 = vector.load %arg5[%c3_95, %c0_96, %c0_97] : memref<9x1x128xf32, #tpu.memory_space<vmem>>, vector<1x1x128xf32>
    %110 = vector.shape_cast %109 : vector<1x1x128xf32> to vector<1x128xf32>
    %111 = vector.shape_cast %110 : vector<1x128xf32> to vector<1x1x128xf32>
    %112 = vector.broadcast %111 : vector<1x1x128xf32> to vector<8x8x128xf32>
    %113 = arith.mulf %108, %112 : vector<8x8x128xf32>
    %114 = arith.addf %107, %113 : vector<8x8x128xf32>
    %c1_98 = arith.constant 1 : index
    %c8_99 = arith.constant 8 : index
    %c0_100 = arith.constant 0 : index
    %115 = vector.load %arg9[%c1_98, %c8_99, %c0_100] : memref<10x24x128xf32, #tpu.memory_space<vmem>>, vector<8x8x128xf32>
    %c4_101 = arith.constant 4 : index
    %c0_102 = arith.constant 0 : index
    %c0_103 = arith.constant 0 : index
    %116 = vector.load %arg5[%c4_101, %c0_102, %c0_103] : memref<9x1x128xf32, #tpu.memory_space<vmem>>, vector<1x1x128xf32>
    %117 = vector.shape_cast %116 : vector<1x1x128xf32> to vector<1x128xf32>
    %118 = vector.shape_cast %117 : vector<1x128xf32> to vector<1x1x128xf32>
    %119 = vector.broadcast %118 : vector<1x1x128xf32> to vector<8x8x128xf32>
    %120 = arith.mulf %115, %119 : vector<8x8x128xf32>
    %121 = arith.addf %114, %120 : vector<8x8x128xf32>
    %c1_104 = arith.constant 1 : index
    %c9_105 = arith.constant 9 : index
    %c0_106 = arith.constant 0 : index
    %122 = vector.load %arg9[%c1_104, %c9_105, %c0_106] : memref<10x24x128xf32, #tpu.memory_space<vmem>>, vector<8x8x128xf32>
    %c5_107 = arith.constant 5 : index
    %c0_108 = arith.constant 0 : index
    %c0_109 = arith.constant 0 : index
    %123 = vector.load %arg5[%c5_107, %c0_108, %c0_109] : memref<9x1x128xf32, #tpu.memory_space<vmem>>, vector<1x1x128xf32>
    %124 = vector.shape_cast %123 : vector<1x1x128xf32> to vector<1x128xf32>
    %125 = vector.shape_cast %124 : vector<1x128xf32> to vector<1x1x128xf32>
    %126 = vector.broadcast %125 : vector<1x1x128xf32> to vector<8x8x128xf32>
    %127 = arith.mulf %122, %126 : vector<8x8x128xf32>
    %128 = arith.addf %121, %127 : vector<8x8x128xf32>
    %c2_110 = arith.constant 2 : index
    %c7_111 = arith.constant 7 : index
    %c0_112 = arith.constant 0 : index
    %129 = vector.load %arg9[%c2_110, %c7_111, %c0_112] : memref<10x24x128xf32, #tpu.memory_space<vmem>>, vector<8x8x128xf32>
    %c6_113 = arith.constant 6 : index
    %c0_114 = arith.constant 0 : index
    %c0_115 = arith.constant 0 : index
    %130 = vector.load %arg5[%c6_113, %c0_114, %c0_115] : memref<9x1x128xf32, #tpu.memory_space<vmem>>, vector<1x1x128xf32>
    %131 = vector.shape_cast %130 : vector<1x1x128xf32> to vector<1x128xf32>
    %132 = vector.shape_cast %131 : vector<1x128xf32> to vector<1x1x128xf32>
    %133 = vector.broadcast %132 : vector<1x1x128xf32> to vector<8x8x128xf32>
    %134 = arith.mulf %129, %133 : vector<8x8x128xf32>
    %135 = arith.addf %128, %134 : vector<8x8x128xf32>
    %c2_116 = arith.constant 2 : index
    %c8_117 = arith.constant 8 : index
    %c0_118 = arith.constant 0 : index
    %136 = vector.load %arg9[%c2_116, %c8_117, %c0_118] : memref<10x24x128xf32, #tpu.memory_space<vmem>>, vector<8x8x128xf32>
    %c7_119 = arith.constant 7 : index
    %c0_120 = arith.constant 0 : index
    %c0_121 = arith.constant 0 : index
    %137 = vector.load %arg5[%c7_119, %c0_120, %c0_121] : memref<9x1x128xf32, #tpu.memory_space<vmem>>, vector<1x1x128xf32>
    %138 = vector.shape_cast %137 : vector<1x1x128xf32> to vector<1x128xf32>
    %139 = vector.shape_cast %138 : vector<1x128xf32> to vector<1x1x128xf32>
    %140 = vector.broadcast %139 : vector<1x1x128xf32> to vector<8x8x128xf32>
    %141 = arith.mulf %136, %140 : vector<8x8x128xf32>
    %142 = arith.addf %135, %141 : vector<8x8x128xf32>
    %c2_122 = arith.constant 2 : index
    %c9_123 = arith.constant 9 : index
    %c0_124 = arith.constant 0 : index
    %143 = vector.load %arg9[%c2_122, %c9_123, %c0_124] : memref<10x24x128xf32, #tpu.memory_space<vmem>>, vector<8x8x128xf32>
    %c8_125 = arith.constant 8 : index
    %c0_126 = arith.constant 0 : index
    %c0_127 = arith.constant 0 : index
    %144 = vector.load %arg5[%c8_125, %c0_126, %c0_127] : memref<9x1x128xf32, #tpu.memory_space<vmem>>, vector<1x1x128xf32>
    %145 = vector.shape_cast %144 : vector<1x1x128xf32> to vector<1x128xf32>
    %146 = vector.shape_cast %145 : vector<1x128xf32> to vector<1x1x128xf32>
    %147 = vector.broadcast %146 : vector<1x1x128xf32> to vector<8x8x128xf32>
    %148 = arith.mulf %143, %147 : vector<8x8x128xf32>
    %149 = arith.addf %142, %148 : vector<8x8x128xf32>
    %150 = vector.shape_cast %149 : vector<8x8x128xf32> to vector<64x128xf32>
    %151 = arith.truncf %150 : vector<64x128xf32> to vector<64x128xbf16>
    %c0_128 = arith.constant 0 : index
    %c0_129 = arith.constant 0 : index
    %152 = vector.load %arg6[%c0_128, %c0_129] : memref<128x128xbf16, #tpu.memory_space<vmem>>, vector<128x128xbf16>
    %cst_130 = arith.constant dense<0.000000e+00> : vector<64x128xf32>
    %153 = tpu.matmul %151, %152, %cst_130 {dimension_numbers = #tpu.dot_dimension_numbers<[1], [0], [0], [1], [0, 0, 1, 1], [], []>} : vector<64x128xbf16>, vector<128x128xbf16>, vector<64x128xf32> -> vector<64x128xf32>
    %c0_131 = arith.constant 0 : index
    %c0_132 = arith.constant 0 : index
    %154 = vector.load %arg7[%c0_131, %c0_132] : memref<1x128xf32, #tpu.memory_space<vmem>>, vector<1x128xf32>
    %155 = vector.broadcast %154 : vector<1x128xf32> to vector<64x128xf32>
    %156 = arith.addf %153, %155 : vector<64x128xf32>
    %cst_133 = arith.constant 0.000000e+00 : f32
    %157 = vector.broadcast %cst_133 : f32 to vector<64x128xf32>
    %158 = arith.maximumf %156, %157 : vector<64x128xf32>
    %159 = vector.shape_cast %158 : vector<64x128xf32> to vector<8x8x128xf32>
    %c0_134 = arith.constant 0 : index
    %c0_135 = arith.constant 0 : index
    %c0_136 = arith.constant 0 : index
    %c0_137 = arith.constant 0 : index
    %160 = vector.load %arg8[%c0_134, %c0_135, %c0_136, %c0_137] : memref<1x8x8x128xf32, #tpu.memory_space<vmem>>, vector<1x8x8x128xf32>
    %161 = vector.shape_cast %160 : vector<1x8x8x128xf32> to vector<8x8x128xf32>
    %162 = vector.shape_cast %159 : vector<8x8x128xf32> to vector<1x8x8x128xf32>
    tpu.vector_store %arg8[%c0_134, %c0_135, %c0_136, %c0_137], %162 {strides = array<i32>} : memref<1x8x8x128xf32, #tpu.memory_space<vmem>>, vector<1x8x8x128xf32>,
    return
  }
  func.func @transform_0(%arg0: i32) -> (i32, i32, i32, i32) {
    %c0_i32 = arith.constant 0 : i32
    %c0_i32_0 = arith.constant 0 : i32
    %c0_i32_1 = arith.constant 0 : i32
    %c0_i32_2 = arith.constant 0 : i32
    return %arg0, %c0_i32, %c0_i32_0, %c0_i32_1 : i32, i32, i32, i32
  }
  func.func @transform_1(%arg0: i32) -> (i32, i32, i32) {
    %c0_i32 = arith.constant 0 : i32
    %c0_i32_0 = arith.constant 0 : i32
    %c0_i32_1 = arith.constant 0 : i32
    %c0_i32_2 = arith.constant 0 : i32
    return %c0_i32, %c0_i32_0, %c0_i32_1 : i32, i32, i32
  }
  func.func @transform_2(%arg0: i32) -> (i32, i32) {
    %c0_i32 = arith.constant 0 : i32
    %c0_i32_0 = arith.constant 0 : i32
    %c0_i32_1 = arith.constant 0 : i32
    return %c0_i32, %c0_i32_0 : i32, i32
  }
  func.func @transform_3(%arg0: i32) -> (i32, i32) {
    %c0_i32 = arith.constant 0 : i32
    %c0_i32_0 = arith.constant 0 : i32
    %c0_i32_1 = arith.constant 0 : i32
    return %c0_i32, %c0_i32_0 : i32, i32
  }
  func.func @transform_4(%arg0: i32) -> (i32, i32, i32) {
    %c0_i32 = arith.constant 0 : i32
    %c0_i32_0 = arith.constant 0 : i32
    %c0_i32_1 = arith.constant 0 : i32
    %c0_i32_2 = arith.constant 0 : i32
    return %c0_i32, %c0_i32_0, %c0_i32_1 : i32, i32, i32
  }
  func.func @transform_5(%arg0: i32) -> (i32, i32) {
    %c0_i32 = arith.constant 0 : i32
    %c0_i32_0 = arith.constant 0 : i32
    %c0_i32_1 = arith.constant 0 : i32
    return %c0_i32, %c0_i32_0 : i32, i32
  }
  func.func @transform_6(%arg0: i32) -> (i32, i32) {
    %c0_i32 = arith.constant 0 : i32
    %c0_i32_0 = arith.constant 0 : i32
    %c0_i32_1 = arith.constant 0 : i32
    return %c0_i32, %c0_i32_0 : i32, i32
  }
  func.func @transform_7(%arg0: i32) -> (i32, i32, i32, i32) {
    %c0_i32 = arith.constant 0 : i32
    %c0_i32_0 = arith.constant 0 : i32
    %c0_i32_1 = arith.constant 0 : i32
    %c0_i32_2 = arith.constant 0 : i32
    return %arg0, %c0_i32, %c0_i32_0, %c0_i32_1 : i32, i32, i32, i32
  }
}

</mosaic_0001>

<bundles_post_ra>
// kernel: sepconv_forward.1
= control target key start
LH: loop header
LB: loop body
LE: loop exit
PB: predicated region body
PF: predicated region fallthrough
CT: control target
= control target key end

     0   :  { %s1286_s24 = smov 0   ;;  %s1658_s0 = inlined_call_operand.vmem [shape: f32[8,9,9,4], index: 0, kind: input, shape index: {}]   ;;  %s1659_s1 = inlined_call_operand.vmem [shape: f32[9,1,4], index: 1, kind: input, shape index: {}]   ;;  %s1660_s2 = inlined_call_operand.vmem [shape: bf16[4,128], index: 2, kind: input, shape index: {}]   ;;  %s1661_s3 = inlined_call_operand.vmem [shape: f32[1,128], index: 3, kind: input, shape index: {}]   ;;  %s1662_s4 = inlined_call_operand.vmem [shape: f32[9,1,128], index: 4, kind: input, shape index: {}]   ;;  %s1663_s5 = inlined_call_operand.vmem [shape: bf16[128,128], index: 5, kind: input, shape index: {}]   ;;  %s1664_s6 = inlined_call_operand.vmem [shape: f32[1,128], index: 6, kind: input, shape index: {}]   ;;  %s1665_s7 = inlined_call_operand.vmem [shape: f32[2,8,8,128], index: 7, kind: output, shape index: {}]  }
   0x1 LB: > { %s1292_s25 = sadd.s32 4294967295, %s1243_s24   ;;  %p1066_p0 = scmp.ge.s32.totalorder %s1243_s24, 1  ;;  %s1243_s24 = sphi %s1286_s24, %s17_s24  }
   0x2   : > { %p239_p1 = scmp.lt.s32.totalorder %s1243_s24, 3 }
   0x4   : > { %p240_p2 = pnand %p1066_p0, %p239_p1 }
   0x5   : > { %s1067_s28 = sshll.u32 (!%p240_p2), %s1292_s25, 2  ;;  %p279_p4 = scmp.lt.s32.totalorder (!%p240_p2), %s1292_s25, 1 }
   0x6   : > { %243 = sbr.rel (%p240_p2) target bundleno = 391 (0x187), region = 48  ;;  %p273_p3 = scmp.lt.s32.totalorder (!%p240_p2), %s1067_s28, 7 }
   0xb   : > { %v570_v0 = vld [vmem:[%s1660_s2] sm:$0x3]  ;;  %vm588_vm0 = vcmask 1041408   ;;  %s1667_s28 = smov (!%p273_p3, %s1067_s28), 7  ;;  %v1313_v4 = vld [vmem:[%s1659_s1 + $0x2] ss:$0 sm:$0xff] }
   0xc   : > { %v590_v1 = vsel %vm588_vm0, %v570_v0, 0  ;;  %v1303_v2 = vld [vmem:[%s1659_s1] ss:$0 sm:$0xff]  ;;  %v1308_v3 = vld [vmem:[%s1659_s1 + $0x1] ss:$0 sm:$0xff]  ;;  %s1207_s12 = smul.u32 144, %s1667_s28 }
   0xd   : > { %599 = vmatpush.bf16.msra.mxu0 %v590_v1  ;;  %1190 = vmatpush.bf16.msra.mxu3 %v590_v1  ;;  %v1318_v5 = vld [vmem:[%s1659_s1 + $0x3] ss:$0 sm:$0xff]  ;;  %v1323_v6 = vld [vmem:[%s1659_s1 + $0x4] ss:$0 sm:$0xff]  ;;  %v1328_v7 = vld [vmem:[%s1659_s1 + $0x5] ss:$0 sm:$0xff] }
   0xe   : > { %v1333_v8 = vld [vmem:[%s1659_s1 + $0x6] ss:$0 sm:$0xff]  ;;  %v1338_v9 = vld [vmem:[%s1659_s1 + $0x7] ss:$0 sm:$0xff]  ;;  %s1343_s27 = scalar_lea.vmem %s1658_s0, %s1207_s12  ;;  %v1348_v10 = vld [vmem:[%s1659_s1 + $0x8] ss:$0 sm:$0xff] }
   0xf   : > { %v309_v11 = vld [vmem:[%s1343_s27] sm:$0xff]  ;;  %v310_v12 = vld [vmem:[%s1343_s27 + $0x10] sm:$0xff]  ;;  %vm575_vm1 = vcmask 31744   ;;  %s1669_s25 = smov (!%p279_p4, %s1292_s25), 1 }
  0x10   : > { %v1071_v13 = vld [vmem:[%s1343_s27 + $0x90] sm:$0xff]  ;;  %v321_v14 = vmul.f32 %v1303_v2, %v309_v11  ;;  %v322_v15 = vmul.f32 %v1303_v2, %v310_v12  ;;  %v1072_v16 = vld [vmem:[%s1343_s27 + $0xa0] sm:$0xff]  ;;  %v1360_v20 = vmul.f32 %v1333_v8, %v310_v12  ;;  %s1181_s26 = sshll.u32 %s1669_s25, 6 }
  0x11   : > { %v343_v17 = vmul.f32 %v1308_v3, %v1071_v13  ;;  %v359_v18 = vld [vmem:[%s1343_s27 + $0x1] sm:$0xff]  ;;  %v360_v19 = vld [vmem:[%s1343_s27 + $0x11] sm:$0xff]  ;;  %v344_v21 = vmul.f32 %v1308_v3, %v1072_v16  ;;  %v1369_v27 = vmul.f32 %v1338_v9, %v1072_v16  ;;  %s283_s29 = scalar_lea.vmem %s1665_s7, %s1181_s26 }
  0x12   : > { %v372_v22 = vmul.f32 %v1313_v4, %v359_v18  ;;  %v373_v23 = vmul.f32 %v1313_v4, %v360_v19  ;;  %v1081_v24 = vld [vmem:[%s1343_s27 + $0x120] sm:$0xff]  ;;  %v1082_v25 = vld [vmem:[%s1343_s27 + $0x130] sm:$0xff]  ;;  %v1386_v45 = vmul.f32 %v1348_v10, %v360_v19 }
  0x13   : > { %v1090_v26 = vld [vmem:[%s1343_s27 + $0x1b0] sm:$0xff]  ;;  %v351_v28 = vadd.f32 %v343_v17, %v321_v14  ;;  %v402_v29 = vmul.f32 %v1318_v5, %v1081_v24  ;;  %v403_v30 = vmul.f32 %v1318_v5, %v1082_v25  ;;  %v1091_v31 = vld [vmem:[%s1343_s27 + $0x1c0] sm:$0xff]  ;;  %v352_v35 = vadd.f32 %v344_v21, %v322_v15 }
  0x14   : > { %v432_v32 = vmul.f32 %v1323_v6, %v1090_v26  ;;  %v1099_v33 = vld [vmem:[%s1343_s27 + $0x121] sm:$0xff]  ;;  %v1100_v34 = vld [vmem:[%s1343_s27 + $0x131] sm:$0xff]  ;;  %v433_v36 = vmul.f32 %v1323_v6, %v1091_v31 }
  0x15   : > { %v461_v37 = vmul.f32 %v1328_v7, %v1099_v33  ;;  %v462_v38 = vmul.f32 %v1328_v7, %v1100_v34  ;;  %v1109_v39 = vld [vmem:[%s1343_s27 + $0x20] sm:$0xff]  ;;  %v1118_v40 = vld [vmem:[%s1343_s27 + $0xb0] sm:$0xff]  ;;  %v380_v42 = vadd.f32 %v372_v22, %v351_v28  ;;  %v381_v49 = vadd.f32 %v373_v23, %v352_v35 }
  0x16   : > { %v1127_v41 = vld [vmem:[%s1343_s27 + $0x21] sm:$0xff]  ;;  %v492_v43 = vmul.f32 %v1333_v8, %v1109_v39  ;;  %v522_v44 = vmul.f32 %v1338_v9, %v1118_v40  ;;  %v312_v46 = vld [vmem:[%s1343_s27 + $0x30] sm:$0xff]  ;;  %v323_v51 = vmul.f32 %v1303_v2, %v1109_v39  ;;  %v345_v57 = vmul.f32 %v1308_v3, %v1118_v40 }
  0x17   : > { %v1074_v47 = vld [vmem:[%s1343_s27 + $0xc0] sm:$0xff]  ;;  %v362_v48 = vld [vmem:[%s1343_s27 + $0x31] sm:$0xff]  ;;  %v1392_v50 = vmul.f32 %v1348_v10, %v1127_v41  ;;  %v324_v52 = vmul.f32 %v1303_v2, %v312_v46  ;;  %v410_v56 = vadd.f32 %v402_v29, %v380_v42  ;;  %v374_v59 = vmul.f32 %v1313_v4, %v1127_v41 }
  0x18   : > { %v1083_v53 = vld [vmem:[%s1343_s27 + $0x140] sm:$0xff]  ;;  %v1084_v54 = vld [vmem:[%s1343_s27 + $0x150] sm:$0xff]  ;;  %v346_v58 = vmul.f32 %v1308_v3, %v1074_v47  ;;  %v411_v63 = vadd.f32 %v403_v30, %v381_v49  ;;  %v375_v0 = vmul.f32 %v1313_v4, %v362_v48  ;;  %v353_v13 = vadd.f32 %v345_v57, %v323_v51 }
  0x19   : > { %v1092_v55 = vld [vmem:[%s1343_s27 + $0x1d0] sm:$0xff]  ;;  %v1093_v60 = vld [vmem:[%s1343_s27 + $0x1e0] sm:$0xff]  ;;  %v404_v1 = vmul.f32 %v1318_v5, %v1083_v53  ;;  %v405_v11 = vmul.f32 %v1318_v5, %v1084_v54  ;;  %v440_v12 = vadd.f32 %v432_v32, %v410_v56  ;;  %v493_v26 = vmul.f32 %v1333_v8, %v312_v46 }
  0x1a   : > { %v1101_v61 = vld [vmem:[%s1343_s27 + $0x141] sm:$0xff]  ;;  %v1102_v62 = vld [vmem:[%s1343_s27 + $0x151] sm:$0xff]  ;;  %v354_v14 = vadd.f32 %v346_v58, %v324_v52  ;;  %v434_v15 = vmul.f32 %v1323_v6, %v1092_v55  ;;  %v441_v18 = vadd.f32 %v433_v36, %v411_v63  ;;  %v435_v19 = vmul.f32 %v1323_v6, %v1093_v60 }
  0x1b   : > { %v1111_v16 = vld [vmem:[%s1343_s27 + $0x40] sm:$0xff]  ;;  %v1120_v17 = vld [vmem:[%s1343_s27 + $0xd0] sm:$0xff]  ;;  %v463_v21 = vmul.f32 %v1328_v7, %v1101_v61  ;;  %v464_v22 = vmul.f32 %v1328_v7, %v1102_v62  ;;  %v469_v23 = vadd.f32 %v461_v37, %v440_v12  ;;  %v382_v24 = vadd.f32 %v374_v59, %v353_v13 }
  0x1c   : > { %v383_v25 = vadd.f32 %v375_v0, %v354_v14  ;;  %v1129_v28 = vld [vmem:[%s1343_s27 + $0x41] sm:$0xff]  ;;  %v314_v29 = vld [vmem:[%s1343_s27 + $0x50] sm:$0xff]  ;;  %v470_v30 = vadd.f32 %v462_v38, %v441_v18  ;;  %v494_v31 = vmul.f32 %v1333_v8, %v1111_v16  ;;  %v523_v32 = vmul.f32 %v1338_v9, %v1074_v47 }
  0x1d   : > { %v524_v33 = vmul.f32 %v1338_v9, %v1120_v17  ;;  %v499_v34 = vadd.f32 %v1360_v20, %v469_v23  ;;  %v412_v35 = vadd.f32 %v404_v1, %v382_v24  ;;  %v552_v37 = vmul.f32 %v1348_v10, %v362_v48  ;;  %v1076_v39 = vld [vmem:[%s1343_s27 + $0xe0] sm:$0xff]  ;;  %v1424_v40 = vld [vmem:[%s1343_s27 + $0x51] sm:$0xff] }
  0x1e   : > { %v413_v36 = vadd.f32 %v405_v11, %v383_v25  ;;  %v500_v38 = vadd.f32 %v492_v43, %v470_v30  ;;  %v553_v41 = vmul.f32 %v1348_v10, %v1129_v28  ;;  %v325_v42 = vmul.f32 %v1303_v2, %v1111_v16  ;;  %v1085_v51 = vld [vmem:[%s1343_s27 + $0x160] sm:$0xff]  ;;  %v1086_v52 = vld [vmem:[%s1343_s27 + $0x170] sm:$0xff] }
  0x1f   : > { %v326_v46 = vmul.f32 %v1303_v2, %v314_v29  ;;  %v529_v47 = vadd.f32 %v1369_v27, %v499_v34  ;;  %v442_v20 = vadd.f32 %v434_v15, %v412_v35  ;;  %v347_v48 = vmul.f32 %v1308_v3, %v1120_v17  ;;  %v1094_v56 = vld [vmem:[%s1343_s27 + $0x1f0] sm:$0xff]  ;;  %v1095_v57 = vld [vmem:[%s1343_s27 + $0x200] sm:$0xff] }
  0x20   : > { %v443_v49 = vadd.f32 %v435_v19, %v413_v36  ;;  %v530_v53 = vadd.f32 %v522_v44, %v500_v38  ;;  %v348_v54 = vmul.f32 %v1308_v3, %v1076_v39  ;;  %v376_v43 = vmul.f32 %v1313_v4, %v1129_v28  ;;  %v1103_v58 = vld [vmem:[%s1343_s27 + $0x161] sm:$0xff]  ;;  %v1104_v62 = vld [vmem:[%s1343_s27 + $0x171] sm:$0xff] }
  0x21   : > { %v377_v55 = vmul.f32 %v1313_v4, %v1424_v40  ;;  %v558_v27 = vadd.f32 %v1386_v45, %v529_v47  ;;  %v471_v59 = vadd.f32 %v463_v21, %v442_v20  ;;  %v355_v61 = vadd.f32 %v347_v48, %v325_v42  ;;  %v1113_v21 = vld [vmem:[%s1343_s27 + $0x60] sm:$0xff]  ;;  %v316_v24 = vld [vmem:[%s1343_s27 + $0x70] sm:$0xff] }
  0x22   : > { %v472_v60 = vadd.f32 %v464_v22, %v443_v49  ;;  %v559_v63 = vadd.f32 %v1392_v50, %v530_v53  ;;  %v356_v44 = vadd.f32 %v348_v54, %v326_v46  ;;  %v406_v0 = vmul.f32 %v1318_v5, %v1085_v51  ;;  %v1122_v35 = vld [vmem:[%s1343_s27 + $0xf0] sm:$0xff]  ;;  %v1087_v42 = vld [vmem:[%s1343_s27 + $0x180] sm:$0xff] }
  0x23   : > { %v407_v1 = vmul.f32 %v1318_v5, %v1086_v52  ;;  %v501_v11 = vadd.f32 %v493_v26, %v471_v59  ;;  %v384_v13 = vadd.f32 %v376_v43, %v355_v61  ;;  %v436_v14 = vmul.f32 %v1323_v6, %v1094_v56  ;;  %v1088_v20 = vld [vmem:[%s1343_s27 + $0x190] sm:$0xff] }
  0x24   : > { %v502_v12 = vadd.f32 %v494_v31, %v472_v60  ;;  %v566_v15 = vpack.c.bf16 %v559_v63, %v558_v27  ;;  %v385_v45 = vadd.f32 %v377_v55, %v356_v44  ;;  %v437_v16 = vmul.f32 %v1323_v6, %v1095_v57  ;;  %v1078_v31 = vld [vmem:[%s1343_s27 + $0x100] sm:$0xff]  ;;  %v1096_v43 = vld [vmem:[%s1343_s27 + $0x210] sm:$0xff] }
  0x25   : > { %v531_v17 = vadd.f32 %v523_v32, %v501_v11  ;;  %v414_v50 = vadd.f32 %v406_v0, %v384_v13  ;;  %v465_v19 = vmul.f32 %v1328_v7, %v1103_v58  ;;  %v466_v23 = vmul.f32 %v1328_v7, %v1104_v62  ;;  %v366_v32 = vld [vmem:[%s1343_s27 + $0x71] sm:$0xff]  ;;  %v1105_v0 = vld [vmem:[%s1343_s27 + $0x181] sm:$0xff] }
  0x26   : > { %v532_v18 = vadd.f32 %v524_v33, %v502_v12  ;;  %1135 = vmatmul.msk.bf16.vlgmr.msra.gmra.mxu0 %vm575_vm1, %v566_v15  ;;  %v415_v22 = vadd.f32 %v407_v1, %v385_v45  ;;  %v495_v30 = vmul.f32 %v1333_v8, %v314_v29  ;;  %v496_v34 = vmul.f32 %v1333_v8, %v1113_v21  ;;  %v1106_v1 = vld [vmem:[%s1343_s27 + $0x191] sm:$0xff]  ;;  %v1115_v45 = vld [vmem:[%s1343_s27 + $0x80] sm:$0xff] }
  0x27   : > { %v560_v25 = vadd.f32 %v552_v37, %v531_v17  ;;  %v444_v28 = vadd.f32 %v436_v14, %v414_v50  ;;  %v525_v36 = vmul.f32 %v1338_v9, %v1076_v39  ;;  %v327_v38 = vmul.f32 %v1303_v2, %v1113_v21  ;;  %v1131_v37 = vld [vmem:[%s1343_s27 + $0x61] sm:$0xff] }
  0x28   : > { %v561_v26 = vadd.f32 %v553_v41, %v532_v18  ;;  %v445_v33 = vadd.f32 %v437_v16, %v415_v22  ;;  %v328_v41 = vmul.f32 %v1303_v2, %v316_v24  ;;  %v349_v29 = vmul.f32 %v1308_v3, %v1122_v35 }
  0x29   : > { %v473_v47 = vadd.f32 %v465_v19, %v444_v28  ;;  %v350_v48 = vmul.f32 %v1308_v3, %v1078_v31  ;;  %v378_v51 = vmul.f32 %v1313_v4, %v1131_v37  ;;  %v379_v39 = vmul.f32 %v1313_v4, %v366_v32  ;;  %v1097_v3 = vld [vmem:[%s1343_s27 + $0x220] sm:$0xff]  ;;  %v1124_v19 = vld [vmem:[%s1343_s27 + $0x110] sm:$0xff] }
  0x2a   : > { %v567_v46 = vpack.c.bf16 %v561_v26, %v560_v25  ;;  %v474_v49 = vadd.f32 %v466_v23, %v445_v33  ;;  %v526_v53 = vmul.f32 %v1338_v9, %v1122_v35  ;;  %v357_v54 = vadd.f32 %v349_v29, %v327_v38  ;;  %v1133_v25 = vld [vmem:[%s1343_s27 + $0x81] sm:$0xff]  ;;  %v1511_v38 = vld [vmem:[%s1661_s3] ss:$0 sm:$0xff] }
  0x2b   : > { %v503_v52 = vadd.f32 %v495_v30, %v473_v47  ;;  %v408_v2 = vmul.f32 %v1318_v5, %v1087_v42  ;;  %v358_v56 = vadd.f32 %v350_v48, %v328_v41  ;;  %v409_v57 = vmul.f32 %v1318_v5, %v1088_v20  ;;  %v1184_v42 = vld [vmem:[%s1663_s5 + $0x10] sm:$0xff]  ;;  %v1183_v29 = vld [vmem:[%s1663_s5 + $0x8] sm:$0xff]  ;;  %v1528_v20 = vld [vmem:[%s1662_s4 + $0x1] ss:$0 sm:$0xff] }
  0x2c   : > { %1136 = vmatmul.msk.bf16.vlgmr.msra.gmra.mxu3 %vm575_vm1, %v567_v46  ;;  %v504_v55 = vadd.f32 %v496_v34, %v474_v49  ;;  %v386_v58 = vadd.f32 %v378_v51, %v357_v54  ;;  %v554_v4 = vmul.f32 %v1348_v10, %v1424_v40  ;;  %v555_v27 = vmul.f32 %v1348_v10, %v1131_v37  ;;  %v1519_v46 = vld [vmem:[%s1662_s4] ss:$0 sm:$0xff] }
  0x2d   : > { %v387_v59 = vadd.f32 %v379_v39, %v358_v56  ;;  %v438_v60 = vmul.f32 %v1323_v6, %v1096_v43  ;;  %v533_v61 = vadd.f32 %v525_v36, %v503_v52  ;;  %v439_v44 = vmul.f32 %v1323_v6, %v1097_v3  ;;  %v1185_v36 = vld [vmem:[%s1663_s5 + $0x18] sm:$0xff]  ;;  %v1535_v39 = vld [vmem:[%s1662_s4 + $0x2] ss:$0 sm:$0xff] }
  0x2e   : > { %v534_v62 = vadd.f32 %v526_v53, %v504_v55  ;;  %v416_v63 = vadd.f32 %v408_v2, %v386_v58  ;;  %v467_v11 = vmul.f32 %v1328_v7, %v1105_v0  ;;  %v468_v12 = vmul.f32 %v1328_v7, %v1106_v1  ;;  %v1182_v53 = vld [vmem:[%s1663_s5] sm:$0xff] }
  0x2f   : > { %v417_v5 = vadd.f32 %v409_v57, %v387_v59  ;;  %v562_v40 = vadd.f32 %v554_v4, %v533_v61  ;;  %v497_v16 = vmul.f32 %v1333_v8, %v316_v24  ;;  %v498_v6 = vmul.f32 %v1333_v8, %v1115_v45  ;;  %v1189_v8 = vld [vmem:[%s1663_s5 + $0x38] sm:$0xff]  ;;  %v1546_v4 = vld [vmem:[%s1662_s4 + $0x3] ss:$0 sm:$0xff]  ;;  %v1560_v0 = vld [vmem:[%s1662_s4 + $0x5] ss:$0 sm:$0xff] }
  0x30   : > { %v563_v13 = vadd.f32 %v555_v27, %v534_v62  ;;  %v446_v14 = vadd.f32 %v438_v60, %v416_v63  ;;  %v527_v7 = vmul.f32 %v1338_v9, %v1078_v31  ;;  %v528_v23 = vmul.f32 %v1338_v9, %v1124_v19  ;;  %962 = vmatpush.bf16.msrb.mxu0 %v1189_v8  ;;  %v1188_v9 = vld [vmem:[%s1663_s5 + $0x30] sm:$0xff]  ;;  %v1551_v27 = vld [vmem:[%s1662_s4 + $0x4] ss:$0 sm:$0xff] }
  0x31   : > { %v447_v15 = vadd.f32 %v439_v44, %v417_v5  ;;  %v556_v30 = vmul.f32 %v1348_v10, %v366_v32  ;;  %v557_v24 = vmul.f32 %v1348_v10, %v1133_v25  ;;  %1191 = vmatpush.bf16.msra.mxu1 %v1189_v8  ;;  %1192 = vmatpush.bf16.msra.mxu2 %v1189_v8  ;;  %v1245_v31 = vmov 0.0   ;;  %v1187_v10 = vld [vmem:[%s1663_s5 + $0x28] sm:$0xff]  ;;  %v1186_v32 = vld [vmem:[%s1663_s5 + $0x20] sm:$0xff] }
  0x32   : > { %v568_v17 = vpack.c.bf16 %v563_v13, %v562_v40  ;;  %v475_v18 = vadd.f32 %v467_v11, %v446_v14  ;;  %285 = vst [vmem:[#allocation2] sm:$0xff] %v1245_v31  ;;  %v670_v51 = vmul.f32 0.0, %v1528_v20 }
  0x33   : > { %v476_v50 = vadd.f32 %v468_v12, %v447_v15  ;;  %286 = vst [vmem:[#allocation2 + $0x8] sm:$0xff] %v1245_v31 }
  0x34   : > { %v505_v21 = vadd.f32 %v497_v16, %v475_v18  ;;  %963 = vmatpush.bf16.msrb.mxu0 %v1188_v9  ;;  %287 = vst [vmem:[#allocation2 + $0x10] sm:$0xff] %v1245_v31  ;;  %v1567_v16 = vld [vmem:[%s1662_s4 + $0x6] ss:$0 sm:$0xff] }
  0x35   : > { %v506_v22 = vadd.f32 %v498_v6, %v476_v50  ;;  %1193 = vmatpush.bf16.msra.mxu1 %v1188_v9  ;;  %1194 = vmatpush.bf16.msra.mxu2 %v1188_v9  ;;  %293 = vst [vmem:[#allocation2 + $0x18] sm:$0xff] %v1245_v31 }
  0x36   : > { %v535_v26 = vadd.f32 %v527_v7, %v505_v21  ;;  %294 = vst [vmem:[#allocation2 + $0x30] sm:$0xff] %v1245_v31  ;;  %v1577_v7 = vld [vmem:[%s1662_s4 + $0x7] ss:$0 sm:$0xff] }
  0x37   : > { %v536_v28 = vadd.f32 %v528_v23, %v506_v22  ;;  %295 = vst [vmem:[#allocation2 + $0x48] sm:$0xff] %v1245_v31 }
  0x38   : > { %v564_v33 = vadd.f32 %v556_v30, %v535_v26  ;;  %964 = vmatpush.bf16.msrb.mxu0 %v1187_v10  ;;  %301 = vst [vmem:[#allocation2 + $0x28] sm:$0xff] %v1245_v31 }
  0x39   : > { %v565_v34 = vadd.f32 %v557_v24, %v536_v28  ;;  %1195 = vmatpush.bf16.msra.mxu1 %v1187_v10  ;;  %1196 = vmatpush.bf16.msra.mxu2 %v1187_v10  ;;  %302 = vst [vmem:[#allocation2 + $0x40] sm:$0xff] %v1245_v31 }
  0x3a   : > { %303 = vst [vmem:[#allocation2 + $0x58] sm:$0xff] %v1245_v31  ;;  %v637_v37 = vld [vmem:[#allocation2 + $0x7] sm:$0xff] }
  0x3b   : > { %v569_v35 = vpack.c.bf16 %v565_v34, %v564_v33  ;;  %289 = vst [vmem:[#allocation2 + $0xd8] sm:$0xff] %v1245_v31  ;;  %v649_v48 = vmul.f32 %v1519_v46, %v637_v37  ;;  %v686_v52 = vld [vmem:[#allocation2 + $0x9] sm:$0xff] }
  0x3c   : > { %1137 = vmatmul.msk.bf16.gmra.mxu3 %vm575_vm1, %v568_v17  ;;  %965 = vmatpush.bf16.msrb.mxu0 %v1186_v32  ;;  %290 = vst [vmem:[#allocation2 + $0xe0] sm:$0xff] %v1245_v31  ;;  %v699_v2 = vmul.f32 %v1535_v39, %v686_v52 }
  0x3d   : > { %1197 = vmatpush.bf16.msra.mxu1 %v1186_v32  ;;  %1198 = vmatpush.bf16.msra.mxu2 %v1186_v32  ;;  %291 = vst [vmem:[#allocation2 + $0xe8] sm:$0xff] %v1245_v31  ;;  %v678_v54 = vadd.f32 %v670_v51, %v649_v48 }
  0x3e   : > { %296 = vst [vmem:[#allocation2 + $0x60] sm:$0xff] %v1245_v31 }
  0x3f   : > { %297 = vst [vmem:[#allocation2 + $0x78] sm:$0xff] %v1245_v31  ;;  %v707_v58 = vadd.f32 %v699_v2, %v678_v54 }
  0x40   : > { %966 = vmatpush.bf16.msrb.mxu0 %v1185_v36  ;;  %298 = vst [vmem:[#allocation2 + $0x90] sm:$0xff] %v1245_v31 }
  0x41   : > { %1199 = vmatpush.bf16.msra.mxu1 %v1185_v36  ;;  %1200 = vmatpush.bf16.msra.mxu2 %v1185_v36  ;;  %299 = vst [vmem:[#allocation2 + $0xa8] sm:$0xff] %v1245_v31 }
  0x42   : > { %300 = vst [vmem:[#allocation2 + $0xc0] sm:$0xff] %v1245_v31 }
  0x43   : > { %304 = vst [vmem:[#allocation2 + $0x70] sm:$0xff] %v1245_v31 }
  0x44   : > { %967 = vmatpush.bf16.msrb.mxu0 %v1184_v42  ;;  %305 = vst [vmem:[#allocation2 + $0x88] sm:$0xff] %v1245_v31 }
  0x45   : > { %1201 = vmatpush.bf16.msra.mxu1 %v1184_v42  ;;  %1202 = vmatpush.bf16.msra.mxu2 %v1184_v42  ;;  %306 = vst [vmem:[#allocation2 + $0xa0] sm:$0xff] %v1245_v31 }
  0x46   : > { %307 = vst [vmem:[#allocation2 + $0xb8] sm:$0xff] %v1245_v31 }
  0x47   : > { %308 = vst [vmem:[#allocation2 + $0xd0] sm:$0xff] %v1245_v31  ;;  %v1587_v31 = vld [vmem:[%s1662_s4 + $0x8] ss:$0 sm:$0xff] }
  0x48   : > { %968 = vmatpush.bf16.msrb.mxu0 %v1183_v29 }
  0x49   : > { %1203 = vmatpush.bf16.msra.mxu1 %v1183_v29  ;;  %1204 = vmatpush.bf16.msra.mxu2 %v1183_v29 }
  0x4c   : > { %1138 = vmatmul.msk.bf16.gmra.mxu3 %vm575_vm1, %v569_v35  ;;  %969 = vmatpush.bf16.msrb.mxu0 %v1182_v53 }
  0x4d   : > { %1205 = vmatpush.bf16.msra.mxu1 %v1182_v53  ;;  %1206 = vmatpush.bf16.msra.mxu2 %v1182_v53 }
  0xa3   : > { %v601_v47 = vpop.f32.mrf.mxu0 }
  0xa4   : > { %v602_v41 = vadd.f32 %v1511_v38, %v601_v47 }
  0xa6   : > { %v621_v49 = vmax.f32 %v602_v41, 0.0 }
  0xa8   : > { %629 = vst [vmem:[#allocation2 + $0x20] sm:$0xff] %v621_v49  ;;  %v671_v3 = vmul.f32 %v1528_v20, %v621_v49  ;;  %v757_v44 = vmul.f32 %v1551_v27, %v621_v49 }
  0xab   : > { %v603_v43 = vpop.f32.mrf.mxu0 }
  0xac   : > { %v604_v55 = vadd.f32 %v1511_v38, %v603_v43 }
  0xae   : > { %v622_v57 = vmax.f32 %v604_v55, 0.0 }
  0xaf   : > { %v606_v56 = vpop.f32.mrf.mxu3  ;;  %v638_v60 = vld [vmem:[#allocation2 + $0x1f] sm:$0xff] }
  0xb0   : > { %v607_v59 = vadd.f32 %v1511_v38, %v606_v56  ;;  %v687_v61 = vld [vmem:[#allocation2 + $0x21] sm:$0xff]  ;;  %630 = vst [vmem:[#allocation2 + $0x38] sm:$0xff] %v622_v57  ;;  %v650_v62 = vmul.f32 %v1519_v46, %v638_v60  ;;  %v728_v63 = vmul.f32 %v1546_v4, %v638_v60  ;;  %v672_v6 = vmul.f32 %v1528_v20, %v622_v57 }
  0xb1   : > { %v700_v11 = vmul.f32 %v1535_v39, %v687_v61  ;;  %v786_v40 = vmul.f32 %v1560_v0, %v687_v61  ;;  %v758_v21 = vmul.f32 %v1551_v27, %v622_v57  ;;  %v845_v34 = vmul.f32 %v1577_v7, %v622_v57 }
  0xb2   : > { %v623_v1 = vmax.f32 %v607_v59, 0.0  ;;  %v679_v5 = vadd.f32 %v671_v3, %v650_v62  ;;  %v736_v12 = vadd.f32 %v728_v63, %v707_v58 }
  0xb4   : > { %631 = vst [vmem:[#allocation2 + $0x50] sm:$0xff] %v623_v1  ;;  %v765_v13 = vadd.f32 %v757_v44, %v736_v12  ;;  %v708_v15 = vadd.f32 %v700_v11, %v679_v5  ;;  %v673_v10 = vmul.f32 %v1528_v20, %v623_v1  ;;  %v759_v53 = vmul.f32 %v1551_v27, %v623_v1 }
  0xb5   : > { %v846_v2 = vmul.f32 %v1577_v7, %v623_v1 }
  0xb6   : > { %v794_v45 = vadd.f32 %v786_v40, %v765_v13 }
  0xb7   : > { %v608_v14 = vpop.f32.mrf.mxu3  ;;  %v716_v18 = vld [vmem:[#allocation2 + $0x37] sm:$0xff] }
  0xb8   : > { %v609_v17 = vadd.f32 %v1511_v38, %v608_v14  ;;  %v774_v50 = vld [vmem:[#allocation2 + $0x39] sm:$0xff]  ;;  %v729_v19 = vmul.f32 %v1546_v4, %v716_v18  ;;  %v816_v22 = vmul.f32 %v1567_v16, %v716_v18  ;;  %v651_v25 = vmul.f32 %v1519_v46, %v716_v18 }
  0xb9   : > { %v701_v26 = vmul.f32 %v1535_v39, %v774_v50  ;;  %v787_v30 = vmul.f32 %v1560_v0, %v774_v50  ;;  %v874_v49 = vmul.f32 %v1587_v31, %v774_v50 }
  0xba   : > { %v624_v23 = vmax.f32 %v609_v17, 0.0  ;;  %v737_v28 = vadd.f32 %v729_v19, %v708_v15  ;;  %v824_v33 = vadd.f32 %v816_v22, %v794_v45  ;;  %v680_v8 = vadd.f32 %v672_v6, %v651_v25 }
  0xbb   : > { %v804_v24 = vld [vmem:[#allocation2 + $0x4f] sm:$0xff] }
  0xbc   : > { %632 = vst [vmem:[#allocation2 + $0x68] sm:$0xff] %v624_v23  ;;  %v652_v35 = vmul.f32 %v1519_v46, %v804_v24  ;;  %v766_v9 = vadd.f32 %v758_v21, %v737_v28  ;;  %v709_v32 = vadd.f32 %v701_v26, %v680_v8  ;;  %v730_v36 = vmul.f32 %v1546_v4, %v804_v24  ;;  %v862_v29 = vld [vmem:[#allocation2 + $0x51] sm:$0xff] }
  0xbd   : > { %v817_v37 = vmul.f32 %v1567_v16, %v804_v24  ;;  %v853_v41 = vadd.f32 %v845_v34, %v824_v33  ;;  %v702_v55 = vmul.f32 %v1535_v39, %v862_v29  ;;  %v875_v3 = vmul.f32 %v1587_v31, %v862_v29 }
  0xbe   : > { %v795_v47 = vadd.f32 %v787_v30, %v766_v9  ;;  %v681_v51 = vadd.f32 %v673_v10, %v652_v35  ;;  %v738_v52 = vadd.f32 %v730_v36, %v709_v32  ;;  %v788_v62 = vmul.f32 %v1560_v0, %v862_v29 }
  0xbf   : > { %v611_v42 = vpop.f32.mrf.mxu3  ;;  %v882_v58 = vadd.f32 %v874_v49, %v853_v41  ;;  %v760_v5 = vmul.f32 %v1551_v27, %v624_v23  ;;  %v674_v17 = vmul.f32 %v1528_v20, %v624_v23  ;;  %v847_v22 = vmul.f32 %v1577_v7, %v624_v23 }
  0xc0   : > { %v612_v48 = vadd.f32 %v1511_v38, %v611_v42  ;;  %v825_v54 = vadd.f32 %v817_v37, %v795_v47  ;;  %v767_v56 = vadd.f32 %v759_v53, %v738_v52  ;;  %v710_v60 = vadd.f32 %v702_v55, %v681_v51 }
  0xc2   : > { %v625_v43 = vmax.f32 %v612_v48, 0.0  ;;  %v854_v57 = vadd.f32 %v846_v2, %v825_v54  ;;  %v796_v1 = vadd.f32 %v788_v62, %v767_v56 }
  0xc3   : > { %v718_v59 = vld [vmem:[#allocation2 + $0x67] sm:$0xff] }
  0xc4   : > { %633 = vst [vmem:[#allocation2 + $0x80] sm:$0xff] %v625_v43  ;;  %v731_v61 = vmul.f32 %v1546_v4, %v718_v59  ;;  %v883_v63 = vadd.f32 %v875_v3, %v854_v57  ;;  %v653_v11 = vmul.f32 %v1519_v46, %v718_v59  ;;  %v776_v13 = vld [vmem:[#allocation2 + $0x69] sm:$0xff]  ;;  %v818_v45 = vmul.f32 %v1567_v16, %v718_v59 }
  0xc5   : > { %v789_v50 = vmul.f32 %v1560_v0, %v776_v13  ;;  %v703_v24 = vmul.f32 %v1535_v39, %v776_v13  ;;  %v848_v33 = vmul.f32 %v1577_v7, %v625_v43  ;;  %v675_v9 = vmul.f32 %v1528_v20, %v625_v43 }
  0xc6   : > { %v739_v44 = vadd.f32 %v731_v61, %v710_v60  ;;  %v890_v40 = vpack.c.bf16 %v883_v63, %v882_v58  ;;  %v826_v6 = vadd.f32 %v818_v45, %v796_v1  ;;  %v682_v19 = vadd.f32 %v674_v17, %v653_v11 }
  0xc7   : > { %v613_v12 = vpop.f32.mrf.mxu3  ;;  %v876_v23 = vmul.f32 %v1587_v31, %v776_v13  ;;  %v761_v29 = vmul.f32 %v1551_v27, %v625_v43 }
  0xc8   : > { %v614_v14 = vadd.f32 %v1511_v38, %v613_v12  ;;  %v768_v15 = vadd.f32 %v760_v5, %v739_v44  ;;  %970 = vmatmul.bf16.vlgmr.msrb.gmra.mxu0 %v890_v40  ;;  %v855_v8 = vadd.f32 %v847_v22, %v826_v6  ;;  %v711_v10 = vadd.f32 %v703_v24, %v682_v19 }
  0xca   : > { %v626_v18 = vmax.f32 %v614_v14, 0.0  ;;  %v797_v25 = vadd.f32 %v789_v50, %v768_v15  ;;  %v884_v48 = vadd.f32 %v876_v23, %v855_v8 }
  0xcb   : > { %v806_v21 = vld [vmem:[#allocation2 + $0x7f] sm:$0xff] }
  0xcc   : > { %634 = vst [vmem:[#allocation2 + $0x98] sm:$0xff] %v626_v18  ;;  %v819_v26 = vmul.f32 %v1567_v16, %v806_v21  ;;  %v864_v28 = vld [vmem:[#allocation2 + $0x81] sm:$0xff]  ;;  %v654_v30 = vmul.f32 %v1519_v46, %v806_v21  ;;  %v732_v34 = vmul.f32 %v1546_v4, %v806_v21  ;;  %v762_v57 = vmul.f32 %v1551_v27, %v626_v18 }
  0xcd   : > { %v877_v36 = vmul.f32 %v1587_v31, %v864_v28  ;;  %v704_v52 = vmul.f32 %v1535_v39, %v864_v28  ;;  %v790_v58 = vmul.f32 %v1560_v0, %v864_v28  ;;  %v676_v5 = vmul.f32 %v1528_v20, %v626_v18 }
  0xce   : > { %v827_v35 = vadd.f32 %v819_v26, %v797_v25  ;;  %v683_v37 = vadd.f32 %v675_v9, %v654_v30  ;;  %v740_v41 = vadd.f32 %v732_v34, %v711_v10  ;;  %v849_v14 = vmul.f32 %v1577_v7, %v626_v18 }
  0xcf   : > { %v616_v32 = vpop.f32.mrf.mxu3 }
  0xd0   : > { %v617_v42 = vadd.f32 %v1511_v38, %v616_v32  ;;  %v856_v47 = vadd.f32 %v848_v33, %v827_v35  ;;  %v712_v2 = vadd.f32 %v704_v52, %v683_v37  ;;  %v769_v56 = vadd.f32 %v761_v29, %v740_v41 }
  0xd2   : > { %v627_v49 = vmax.f32 %v617_v42, 0.0  ;;  %v885_v51 = vadd.f32 %v877_v36, %v856_v47  ;;  %v798_v44 = vadd.f32 %v790_v58, %v769_v56  ;;  %v810_v42 = vld [vmem:[#allocation2 + $0xdf] sm:$0xff] }
  0xd3   : > { %v720_v53 = vld [vmem:[#allocation2 + $0x97] sm:$0xff] }
  0xd4   : > { %635 = vst [vmem:[#allocation2 + $0xb0] sm:$0xff] %v627_v49  ;;  %v891_v54 = vpack.c.bf16 %v885_v51, %v884_v48  ;;  %v733_v55 = vmul.f32 %v1546_v4, %v720_v53  ;;  %v820_v43 = vmul.f32 %v1567_v16, %v720_v53  ;;  %v655_v59 = vmul.f32 %v1519_v46, %v720_v53  ;;  %v778_v61 = vld [vmem:[#allocation2 + $0x99] sm:$0xff] }
  0xd5   : > { %v791_v11 = vmul.f32 %v1560_v0, %v778_v61  ;;  %v850_v50 = vmul.f32 %v1577_v7, %v627_v49  ;;  %v677_v25 = vmul.f32 %v1528_v20, %v627_v49  ;;  %v878_v18 = vmul.f32 %v1587_v31, %v778_v61 }
  0xd6   : > { %975 = vmatmul.bf16.vlgmr.msra.gmra.mxu1 %v891_v54  ;;  %v741_v3 = vadd.f32 %v733_v55, %v712_v2  ;;  %v828_v12 = vadd.f32 %v820_v43, %v798_v44  ;;  %v684_v40 = vadd.f32 %v676_v5, %v655_v59  ;;  %v763_v8 = vmul.f32 %v1551_v27, %v627_v49 }
  0xd7   : > { %v618_v60 = vpop.f32.mrf.mxu3  ;;  %v823_v51 = vmul.f32 %v1567_v16, %v810_v42  ;;  %v852_v54 = vmul.f32 0.0, %v1577_v7 }
  0xd8   : > { %v619_v62 = vadd.f32 %v1511_v38, %v618_v60  ;;  %v770_v63 = vadd.f32 %v762_v57, %v741_v3  ;;  %v705_v38 = vmul.f32 %v1535_v39, %v778_v61  ;;  %v857_v22 = vadd.f32 %v849_v14, %v828_v12 }
  0xda   : > { %v628_v1 = vmax.f32 %v619_v62, 0.0  ;;  %v799_v15 = vadd.f32 %v791_v11, %v770_v63  ;;  %v713_v26 = vadd.f32 %v705_v38, %v684_v40 }
  0xdb   : > { %v808_v13 = vld [vmem:[#allocation2 + $0xaf] sm:$0xff] }
  0xdc   : > { %636 = vst [vmem:[#allocation2 + $0xc8] sm:$0xff] %v628_v1  ;;  %v821_v45 = vmul.f32 %v1567_v16, %v808_v13  ;;  %v656_v17 = vmul.f32 %v1519_v46, %v808_v13  ;;  %v866_v6 = vld [vmem:[#allocation2 + $0xb1] sm:$0xff]  ;;  %v734_v19 = vmul.f32 %v1546_v4, %v808_v13  ;;  %v886_v46 = vadd.f32 %v878_v18, %v857_v22 }
  0xdd   : > { %v879_v30 = vmul.f32 %v1587_v31, %v866_v6  ;;  %v706_v35 = vmul.f32 %v1535_v39, %v866_v6  ;;  %v764_v37 = vmul.f32 %v1551_v27, %v628_v1  ;;  %v792_v41 = vmul.f32 %v1560_v0, %v866_v6 }
  0xde   : > { %v829_v21 = vadd.f32 %v821_v45, %v799_v15  ;;  %v685_v24 = vadd.f32 %v677_v25, %v656_v17  ;;  %v742_v33 = vadd.f32 %v734_v19, %v713_v26  ;;  %v851_v27 = vmul.f32 %v1577_v7, %v628_v1 }
  0xe0   : > { %v858_v28 = vadd.f32 %v850_v50, %v829_v21  ;;  %v714_v32 = vadd.f32 %v706_v35, %v685_v24  ;;  %v771_v20 = vadd.f32 %v763_v8, %v742_v33 }
  0xe2   : > { %v887_v34 = vadd.f32 %v879_v30, %v858_v28  ;;  %v800_v49 = vadd.f32 %v792_v41, %v771_v20 }
  0xe3   : > { %v722_v9 = vld [vmem:[#allocation2 + $0xc7] sm:$0xff] }
  0xe4   : > { %v892_v10 = vpack.c.bf16 %v887_v34, %v886_v46  ;;  %v735_v23 = vmul.f32 %v1546_v4, %v722_v9  ;;  %v780_v36 = vld [vmem:[#allocation2 + $0xc9] sm:$0xff]  ;;  %v822_v29 = vmul.f32 %v1567_v16, %v722_v9  ;;  %v868_v4 = vld [vmem:[#allocation2 + $0xe1] sm:$0xff]  ;;  %v1236_v16 = vld [vmem:[%s1664_s6] ss:$0 sm:$0xff] }
  0xe5   : > { %v793_v39 = vmul.f32 %v1560_v0, %v780_v36  ;;  %v881_v55 = vmul.f32 %v1587_v31, %v868_v4  ;;  %v880_v3 = vmul.f32 %v1587_v31, %v780_v36 }
  0xe6   : > { %980 = vmatmul.bf16.vlgmr.msra.gmra.mxu2 %v892_v10  ;;  %v743_v47 = vadd.f32 %v735_v23, %v714_v32  ;;  %v830_v53 = vadd.f32 %v822_v29, %v800_v49 }
  0xe8   : > { %v772_v48 = vadd.f32 %v764_v37, %v743_v47  ;;  %v859_v56 = vadd.f32 %v851_v27, %v830_v53 }
  0xea   : > { %v801_v52 = vadd.f32 %v793_v39, %v772_v48  ;;  %v888_v58 = vadd.f32 %v880_v3, %v859_v56 }
  0xec   : > { %v831_v2 = vadd.f32 %v823_v51, %v801_v52 }
  0xee   : > { %v860_v57 = vadd.f32 %v852_v54, %v831_v2 }
  0xf0   : > { %v889_v0 = vadd.f32 %v881_v55, %v860_v57 }
  0xf2   : > { %v893_v43 = vpack.c.bf16 %v889_v0, %v888_v58 }
  0xf6   : > { %985 = vmatmul.bf16.gmra.mxu2 %v893_v43 }
 0x145   : > { %v971_v59 = vpop.f32.mrf.mxu0 }
 0x146   : > { %v972_v60 = vadd.f32 %v1236_v16, %v971_v59 }
 0x148   : > { %v991_v7 = vmax.f32 %v972_v60, 0.0 }
 0x14a   : > { %999 = vst [vmem:[%s283_s29] sm:$0xff] %v991_v7 }
 0x14d   : > { %v973_v31 = vpop.f32.mrf.mxu0 }
 0x14e   : > { %v974_v61 = vadd.f32 %v1236_v16, %v973_v31 }
 0x150   : > { %v992_v62 = vmax.f32 %v974_v61, 0.0 }
 0x152   : > { %1000 = vst [vmem:[%s283_s29 + $0x8] sm:$0xff] %v992_v62 }
 0x153   : > { %v976_v63 = vpop.f32.mrf.mxu1 }
 0x154   : > { %v977_v44 = vadd.f32 %v1236_v16, %v976_v63 }
 0x156   : > { %v993_v5 = vmax.f32 %v977_v44, 0.0 }
 0x158   : > { %1001 = vst [vmem:[%s283_s29 + $0x10] sm:$0xff] %v993_v5 }
 0x15b   : > { %v978_v1 = vpop.f32.mrf.mxu1 }
 0x15c   : > { %v979_v11 = vadd.f32 %v1236_v16, %v978_v1 }
 0x15e   : > { %v994_v12 = vmax.f32 %v979_v11, 0.0 }
 0x160   : > { %1002 = vst [vmem:[%s283_s29 + $0x18] sm:$0xff] %v994_v12 }
 0x169   : > { %v981_v40 = vpop.f32.mrf.mxu2 }
 0x16a   : > { %v982_v13 = vadd.f32 %v1236_v16, %v981_v40 }
 0x16c   : > { %v995_v14 = vmax.f32 %v982_v13, 0.0 }
 0x16e   : > { %1003 = vst [vmem:[%s283_s29 + $0x20] sm:$0xff] %v995_v14 }
 0x171   : > { %v983_v15 = vpop.f32.mrf.mxu2 }
 0x172   : > { %v984_v45 = vadd.f32 %v1236_v16, %v983_v15 }
 0x174   : > { %v996_v17 = vmax.f32 %v984_v45, 0.0 }
 0x176   : > { %1004 = vst [vmem:[%s283_s29 + $0x28] sm:$0xff] %v996_v17 }
 0x179   : > { %v986_v38 = vpop.f32.mrf.mxu2 }
 0x17a   : > { %v987_v50 = vadd.f32 %v1236_v16, %v986_v38 }
 0x17c   : > { %v997_v6 = vmax.f32 %v987_v50, 0.0 }
 0x17e   : > { %1005 = vst [vmem:[%s283_s29 + $0x30] sm:$0xff] %v997_v6 }
 0x181   : > { %v988_v19 = vpop.f32.mrf.mxu2 }
 0x182   : > { %v989_v21 = vadd.f32 %v1236_v16, %v988_v19 }
 0x184   : > { %v998_v22 = vmax.f32 %v989_v21, 0.0 }
 0x186   : > { %1006 = vst [vmem:[%s283_s29 + $0x38] sm:$0xff] %v998_v22 }
 0x187 PF: > { %s17_s24 = sadd.s32 1, %s1243_s24  }
 0x188   : > { %p14_p5 = scmp.ge.s32.totalorder %s17_s24, 4  }
 0x18a   :  { %16 = sbr.rel (!%p14_p5) target bundleno = 1 (0x1), region = 102 }

</bundles_post_ra>
